<compile_context>
chip_gen: v6e
topology: v6e:2x2x1
jax: 0.10.0
libtpu: 0.0.40
codegen_flags: <defaults>
</compile_context>

<pallas_src>
import functools
import math

import jax
import jax.numpy as jnp
from jax.experimental import pallas as pl
from jax.experimental.pallas import tpu as pltpu

HIDDEN = 128  # fixed by the module definition


def _round_up(x, m):
    return ((x + m - 1) // m) * m


def _cdiv(a, b):
    return -(-a // b)


def _actor_prob_kernel(n_hidden, action_dim, a_pad, compute_dtype, *refs):
    # refs = (s,
    #         W0, b0, ..., W_{n_hidden-1}, b_{n_hidden-1},   # trunk (all ReLU)
    #         W_head, b_head,                                # fused [mu | pad | log_std | pad]
    #         mu_out, std_out)
    s_ref = refs[0]
    trunk_refs = refs[1:1 + 2 * n_hidden]
    w_head_ref = refs[1 + 2 * n_hidden]
    b_head_ref = refs[2 + 2 * n_hidden]
    mu_ref = refs[3 + 2 * n_hidden]
    std_ref = refs[4 + 2 * n_hidden]

    h = s_ref[...].astype(compute_dtype)
    for i in range(n_hidden):
        w = trunk_refs[2 * i][...]            # (in, 128) compute_dtype (MXU operand)
        b = trunk_refs[2 * i + 1][...]        # (1, 128) f32, broadcasts over rows
        h = jnp.dot(h, w, preferred_element_type=jnp.float32) + b
        # Bias add / ReLU in f32 (VPU); cast only the next MXU operand.
        h = jnp.maximum(h, 0.0).astype(compute_dtype)

    # Fused, lane-aligned mu/log_std head: one [tb,128] @ [128, 2*a_pad] matmul.
    head = (jnp.dot(h, w_head_ref[...], preferred_element_type=jnp.float32)
            + b_head_ref[...])
    # mu columns start at lane 0, log_std columns at lane a_pad (tile-aligned).
    # Only the useful columns are exp'd and written back (narrow masked stores).
    mu_ref[...] = head[:, :action_dim].astype(mu_ref.dtype)
    std_ref[...] = jnp.exp(head[:, a_pad:a_pad + action_dim]).astype(std_ref.dtype)


def prepare_actor_prob_params(params, *, compute_dtype=jnp.bfloat16):
    """One-time packing of ActorProb parameters for the kernel.

    Casts MXU operands to compute_dtype, reshapes biases to (1, N) f32, and
    builds the fused, lane-aligned mu/log_std head. Do this once per set of
    weights, NOT per forward call (removes ~10 small XLA ops + an extra HBM
    pass over the weights from every inference step).
    """
    action_dim = params["mu"][0].shape[1]
    a_pad = _round_up(action_dim, HIDDEN)     # 128-lane-aligned head halves
    head_pad = 2 * a_pad

    trunk = []
    for (w, b) in params["model"]:
        trunk.append((jnp.asarray(w, compute_dtype),
                      jnp.asarray(b, jnp.float32).reshape(1, -1)))

    w_mu, b_mu = params["mu"]
    w_ls, b_ls = params["log_std"]
    w_head = jnp.zeros((HIDDEN, head_pad), compute_dtype)
    w_head = w_head.at[:, :action_dim].set(w_mu.astype(compute_dtype))
    w_head = w_head.at[:, a_pad:a_pad + action_dim].set(w_ls.astype(compute_dtype))
    b_head = jnp.zeros((1, head_pad), jnp.float32)
    b_head = b_head.at[:, :action_dim].set(b_mu.astype(jnp.float32))
    b_head = b_head.at[:, a_pad:a_pad + action_dim].set(b_ls.astype(jnp.float32))

    return {
        "trunk": tuple(trunk),
        "head": (w_head, b_head),
        "action_dim": action_dim,
        "a_pad": a_pad,
        "compute_dtype": compute_dtype,
    }


def _choose_batch_tiling(batch, state_dim, in_itemsize, max_batch_tile):
    """Pad batch only to 8 sublanes; pick >=2 (even) blocks when possible."""
    batch8 = _round_up(batch, 8)
    # VMEM guard (only bites for multi-thousand-feature states): keep the
    # double-buffered input tile under ~12 MiB (v7x scoped default is 32 MiB,
    # physical VMEM 64 MiB; weights are only ~0.2 MiB).
    vmem_rows = (12 << 20) // max(1, 2 * state_dim * in_itemsize)
    vmem_rows = max(8, (vmem_rows // 8) * 8)
    max_tile = max(8, min(max_batch_tile, vmem_rows))
    # Block count: enough for the tile cap, and >= 2 (even) once the batch is
    # large enough, so the "parallel" grid axis shards over v7x's two TCs.
    n = _cdiv(batch8, max_tile)
    if batch8 >= 16:
        n = max(n, 2)
    if n > 1 and n % 2:
        n += 1
    tb = _round_up(_cdiv(batch8, n), 8)
    n_blocks = _cdiv(batch8, tb)
    return tb, n_blocks, n_blocks * tb


def actor_prob_forward(s, prepared, *, max_batch_tile=1024):
    """ActorProb forward pass. Returns ((mu, std), None) like the PyTorch module.

    s:        [batch, *state_shape]
    prepared: output of prepare_actor_prob_params().
    """
    compute_dtype = prepared["compute_dtype"]
    action_dim = prepared["action_dim"]
    a_pad = prepared["a_pad"]
    head_pad = 2 * a_pad
    trunk = prepared["trunk"]
    w_head, b_head = prepared["head"]
    n_hidden = len(trunk)

    batch = s.shape[0]
    # Feed the kernel in compute_dtype (halves input read + VMEM in bf16 mode).
    s_flat = s.reshape(batch, -1).astype(compute_dtype)
    state_dim = s_flat.shape[1]

    tb, n_blocks, batch_padded = _choose_batch_tiling(
        batch, state_dim, jnp.dtype(compute_dtype).itemsize, max_batch_tile)
    if batch_padded != batch:
        s_flat = jnp.pad(s_flat, ((0, batch_padded - batch), (0, 0)))

    def _resident(arr):
        # Constant index_map -> block stays VMEM-resident across the batch grid.
        return pl.BlockSpec(arr.shape, lambda i, _n=arr.ndim: (0,) * _n)

    args = [s_flat]
    in_specs = [pl.BlockSpec((tb, state_dim), lambda i: (i, 0))]
    for (w, b) in trunk:
        args += [w, b]
        in_specs += [_resident(w), _resident(b)]
    args += [w_head, b_head]
    in_specs += [_resident(w_head), _resident(b_head)]

    # Two NARROW f32 outputs (block last dim == full array dim, allowed by the
    # (8,128) rule). Accepting masked vst stores cuts HBM writeback ~16x vs the
    # previous 128-wide padded f32 slab when action_dim << 128.
    out_shape = (jax.ShapeDtypeStruct((batch_padded, action_dim), jnp.float32),
                 jax.ShapeDtypeStruct((batch_padded, action_dim), jnp.float32))
    out_specs = (pl.BlockSpec((tb, action_dim), lambda i: (i, 0)),
                 pl.BlockSpec((tb, action_dim), lambda i: (i, 0)))

    flops = 2 * batch_padded * (state_dim * HIDDEN
                                + (n_hidden - 1) * HIDDEN * HIDDEN
                                + HIDDEN * head_pad)
    bytes_accessed = int(sum(a.size * a.dtype.itemsize for a in args)
                         + 2 * batch_padded * action_dim * 4)
    cost = pl.CostEstimate(flops=int(flops),
                           transcendentals=int(batch_padded * action_dim),
                           bytes_accessed=bytes_accessed)

    kernel = functools.partial(_actor_prob_kernel, n_hidden, action_dim, a_pad,
                               compute_dtype)

    mu_out, std_out = pl.pallas_call(
        kernel,
        out_shape=out_shape,
        grid_spec=pltpu.PrefetchScalarGridSpec(
            num_scalar_prefetch=0,
            grid=(n_blocks,),
            in_specs=in_specs,
            out_specs=out_specs,
        ),
        compiler_params=pltpu.CompilerParams(
            dimension_semantics=("parallel",),   # megacore-shards the batch axis on v7x
        ),
        cost_estimate=cost,
    )(*args)

    return (mu_out[:batch], std_out[:batch]), None


def init_actor_prob_params(key, state_dim, action_dim, layer_num, hidden=HIDDEN):
    """Deterministic synthetic parameter init (PyTorch-like uniform fan-in scaling)."""
    params = {"model": []}
    dims = [state_dim] + [hidden] * (layer_num + 1)
    for i in range(layer_num + 1):
        key, kw, kb = jax.random.split(key, 3)
        bound = 1.0 / math.sqrt(dims[i])
        w = jax.random.uniform(kw, (dims[i], dims[i + 1]), jnp.float32, -bound, bound)
        b = jax.random.uniform(kb, (dims[i + 1],), jnp.float32, -bound, bound)
        params["model"].append((w, b))
    for name in ("mu", "log_std"):
        key, kw, kb = jax.random.split(key, 3)
        bound = 1.0 / math.sqrt(hidden)
        w = jax.random.uniform(kw, (hidden, action_dim), jnp.float32, -bound, bound)
        b = jax.random.uniform(kb, (action_dim,), jnp.float32, -bound, bound)
        params[name] = (w, b)
    return params


def _reference_forward(s, params):
    """Plain-JAX f32 reference for correctness checking."""
    batch = s.shape[0]
    h = s.reshape(batch, -1).astype(jnp.float32)
    for (w, b) in params["model"]:
        h = jnp.maximum(h @ w + b, 0.0)
    mu = h @ params["mu"][0] + params["mu"][1]
    std = jnp.exp(h @ params["log_std"][0] + params["log_std"][1])
    return mu, std


if __name__ == "__main__":
    key = jax.random.PRNGKey(0)

    # Small shapes consistent with the module: batch=2, state_shape=(16,), action_shape=(4,)
    batch = 2
    state_shape = (16,)
    action_shape = (4,)
    layer_num = 2
    max_action = 1.0  # stored by the module but unused in forward

    state_dim = math.prod(state_shape)
    action_dim = math.prod(action_shape)

    key, kp, ks = jax.random.split(key, 3)
    params = init_actor_prob_params(kp, state_dim, action_dim, layer_num)
    s = jax.random.normal(ks, (batch,) + state_shape, jnp.float32)
    mu_ref, std_ref = _reference_forward(s, params)

    # 1) exact-semantics validation path (f32 MXU operands) -> tight tolerance
    prepared_f32 = prepare_actor_prob_params(params, compute_dtype=jnp.float32)
    (mu, std), _ = actor_prob_forward(s, prepared_f32)
    mu = jax.block_until_ready(mu)
    std = jax.block_until_ready(std)
    assert mu.shape == (batch, action_dim) and std.shape == (batch, action_dim)
    assert jnp.allclose(mu, mu_ref, atol=1e-5, rtol=1e-5)
    assert jnp.allclose(std, std_ref, atol=1e-5, rtol=1e-5)
    assert bool(jnp.all(std > 0.0))

    # 2) production path (bf16 MXU operands, f32 accumulation) -> bf16 tolerance
    prepared_bf16 = prepare_actor_prob_params(params, compute_dtype=jnp.bfloat16)
    (mu_bf, std_bf), _ = actor_prob_forward(s, prepared_bf16)
    mu_bf = jax.block_until_ready(mu_bf)
    std_bf = jax.block_until_ready(std_bf)
    assert jnp.allclose(mu_bf, mu_ref, atol=5e-2, rtol=5e-2)
    assert jnp.allclose(std_bf, std_ref, atol=5e-2, rtol=5e-2)
    assert bool(jnp.all(std_bf > 0.0))

    # 3) multi-tile grid + minimal row-padding path (f32 for tight comparison):
    #    batch=520 -> tb=264, two "parallel" blocks, padded to 528 rows (was 1024).
    batch2 = 520
    key, ks2 = jax.random.split(key)
    s2 = jax.random.normal(ks2, (batch2,) + state_shape, jnp.float32)
    (mu2, std2), _ = actor_prob_forward(s2, prepared_f32)
    mu2 = jax.block_until_ready(mu2)
    std2 = jax.block_until_ready(std2)
    mu2_ref, std2_ref = _reference_forward(s2, params)
    assert mu2.shape == (batch2, action_dim) and std2.shape == (batch2, action_dim)
    assert jnp.allclose(mu2, mu2_ref, atol=1e-5, rtol=1e-5)
    assert jnp.allclose(std2, std2_ref, atol=1e-5, rtol=1e-5)

    print("KERNEL_OK")
</pallas_src>

<mosaic_0001>
module attributes {stable_mosaic.version = 11 : i64} {
  func.func @_actor_prob_kernel(%arg0: i32, %arg1: memref<8x16xf32, #tpu.memory_space<vmem>>, %arg2: memref<16x128xf32, #tpu.memory_space<vmem>>, %arg3: memref<1x128xf32, #tpu.memory_space<vmem>>, %arg4: memref<128x128xf32, #tpu.memory_space<vmem>>, %arg5: memref<1x128xf32, #tpu.memory_space<vmem>>, %arg6: memref<128x128xf32, #tpu.memory_space<vmem>>, %arg7: memref<1x128xf32, #tpu.memory_space<vmem>>, %arg8: memref<128x256xf32, #tpu.memory_space<vmem>>, %arg9: memref<1x256xf32, #tpu.memory_space<vmem>>, %arg10: memref<8x4xf32, #tpu.memory_space<vmem>>, %arg11: memref<8x4xf32, #tpu.memory_space<vmem>>) attributes {dimension_semantics = [#tpu.dimension_semantics<parallel>], iteration_bounds = array<i64: 1>, scalar_prefetch = 0 : i64, scratch_operands = 0 : i64, tpu.core_type = #tpu.core_type<tc>, window_params = [{transform_indices = @transform_0, window_bounds = array<i64: 8, 16>}, {pipeline_mode = #tpu.pipeline_mode<synchronous>, transform_indices = @transform_1, window_bounds = array<i64: 16, 128>}, {pipeline_mode = #tpu.pipeline_mode<synchronous>, transform_indices = @transform_2, window_bounds = array<i64: 1, 128>}, {pipeline_mode = #tpu.pipeline_mode<synchronous>, transform_indices = @transform_3, window_bounds = array<i64: 128, 128>}, {pipeline_mode = #tpu.pipeline_mode<synchronous>, transform_indices = @transform_4, window_bounds = array<i64: 1, 128>}, {pipeline_mode = #tpu.pipeline_mode<synchronous>, transform_indices = @transform_5, window_bounds = array<i64: 128, 128>}, {pipeline_mode = #tpu.pipeline_mode<synchronous>, transform_indices = @transform_6, window_bounds = array<i64: 1, 128>}, {pipeline_mode = #tpu.pipeline_mode<synchronous>, transform_indices = @transform_7, window_bounds = array<i64: 128, 256>}, {pipeline_mode = #tpu.pipeline_mode<synchronous>, transform_indices = @transform_8, window_bounds = array<i64: 1, 256>}, {transform_indices = @transform_9, window_bounds = array<i64: 8, 4>}, {transform_indices = @transform_10, window_bounds = array<i64: 8, 4>}]} {
    %c0 = arith.constant 0 : index
    %c0_0 = arith.constant 0 : index
    %0 = vector.load %arg1[%c0, %c0_0] : memref<8x16xf32, #tpu.memory_space<vmem>>, vector<8x16xf32>
    %c0_1 = arith.constant 0 : index
    %c0_2 = arith.constant 0 : index
    %1 = vector.load %arg2[%c0_1, %c0_2] : memref<16x128xf32, #tpu.memory_space<vmem>>, vector<16x128xf32>
    %c0_3 = arith.constant 0 : index
    %c0_4 = arith.constant 0 : index
    %2 = vector.load %arg3[%c0_3, %c0_4] : memref<1x128xf32, #tpu.memory_space<vmem>>, vector<1x128xf32>
    %cst = arith.constant dense<0.000000e+00> : vector<8x128xf32>
    %3 = tpu.matmul %0, %1, %cst {dimension_numbers = #tpu.dot_dimension_numbers<[1], [0], [0], [1], [0, 0, 1, 1], [], []>} : vector<8x16xf32>, vector<16x128xf32>, vector<8x128xf32> -> vector<8x128xf32>
    %4 = vector.broadcast %2 : vector<1x128xf32> to vector<8x128xf32>
    %5 = arith.addf %3, %4 : vector<8x128xf32>
    %cst_5 = arith.constant 0.000000e+00 : f32
    %6 = vector.broadcast %cst_5 : f32 to vector<8x128xf32>
    %7 = arith.maximumf %5, %6 : vector<8x128xf32>
    %c0_6 = arith.constant 0 : index
    %c0_7 = arith.constant 0 : index
    %8 = vector.load %arg4[%c0_6, %c0_7] : memref<128x128xf32, #tpu.memory_space<vmem>>, vector<128x128xf32>
    %c0_8 = arith.constant 0 : index
    %c0_9 = arith.constant 0 : index
    %9 = vector.load %arg5[%c0_8, %c0_9] : memref<1x128xf32, #tpu.memory_space<vmem>>, vector<1x128xf32>
    %cst_10 = arith.constant dense<0.000000e+00> : vector<8x128xf32>
    %10 = tpu.matmul %7, %8, %cst_10 {dimension_numbers = #tpu.dot_dimension_numbers<[1], [0], [0], [1], [0, 0, 1, 1], [], []>} : vector<8x128xf32>, vector<128x128xf32>, vector<8x128xf32> -> vector<8x128xf32>
    %11 = vector.broadcast %9 : vector<1x128xf32> to vector<8x128xf32>
    %12 = arith.addf %10, %11 : vector<8x128xf32>
    %cst_11 = arith.constant 0.000000e+00 : f32
    %13 = vector.broadcast %cst_11 : f32 to vector<8x128xf32>
    %14 = arith.maximumf %12, %13 : vector<8x128xf32>
    %c0_12 = arith.constant 0 : index
    %c0_13 = arith.constant 0 : index
    %15 = vector.load %arg6[%c0_12, %c0_13] : memref<128x128xf32, #tpu.memory_space<vmem>>, vector<128x128xf32>
    %c0_14 = arith.constant 0 : index
    %c0_15 = arith.constant 0 : index
    %16 = vector.load %arg7[%c0_14, %c0_15] : memref<1x128xf32, #tpu.memory_space<vmem>>, vector<1x128xf32>
    %cst_16 = arith.constant dense<0.000000e+00> : vector<8x128xf32>
    %17 = tpu.matmul %14, %15, %cst_16 {dimension_numbers = #tpu.dot_dimension_numbers<[1], [0], [0], [1], [0, 0, 1, 1], [], []>} : vector<8x128xf32>, vector<128x128xf32>, vector<8x128xf32> -> vector<8x128xf32>
    %18 = vector.broadcast %16 : vector<1x128xf32> to vector<8x128xf32>
    %19 = arith.addf %17, %18 : vector<8x128xf32>
    %cst_17 = arith.constant 0.000000e+00 : f32
    %20 = vector.broadcast %cst_17 : f32 to vector<8x128xf32>
    %21 = arith.maximumf %19, %20 : vector<8x128xf32>
    %c0_18 = arith.constant 0 : index
    %c0_19 = arith.constant 0 : index
    %22 = vector.load %arg8[%c0_18, %c0_19] : memref<128x256xf32, #tpu.memory_space<vmem>>, vector<128x256xf32>
    %cst_20 = arith.constant dense<0.000000e+00> : vector<8x256xf32>
    %23 = tpu.matmul %21, %22, %cst_20 {dimension_numbers = #tpu.dot_dimension_numbers<[1], [0], [0], [1], [0, 0, 1, 1], [], []>} : vector<8x128xf32>, vector<128x256xf32>, vector<8x256xf32> -> vector<8x256xf32>
    %c0_21 = arith.constant 0 : index
    %c0_22 = arith.constant 0 : index
    %24 = vector.load %arg9[%c0_21, %c0_22] : memref<1x256xf32, #tpu.memory_space<vmem>>, vector<1x256xf32>
    %25 = vector.broadcast %24 : vector<1x256xf32> to vector<8x256xf32>
    %26 = arith.addf %23, %25 : vector<8x256xf32>
    %27 = vector.extract_strided_slice %26 {offsets = [0, 0], sizes = [8, 4], strides = [1, 1]} : vector<8x256xf32> to vector<8x4xf32>
    %c0_23 = arith.constant 0 : index
    %c0_24 = arith.constant 0 : index
    %28 = vector.load %arg10[%c0_23, %c0_24] : memref<8x4xf32, #tpu.memory_space<vmem>>, vector<8x4xf32>
    tpu.vector_store %arg10[%c0_23, %c0_24], %27 {strides = array<i32>} : memref<8x4xf32, #tpu.memory_space<vmem>>, vector<8x4xf32>,
    %29 = vector.extract_strided_slice %26 {offsets = [0, 128], sizes = [8, 4], strides = [1, 1]} : vector<8x256xf32> to vector<8x4xf32>
    %30 = math.exp %29 : vector<8x4xf32>
    %c0_25 = arith.constant 0 : index
    %c0_26 = arith.constant 0 : index
    %31 = vector.load %arg11[%c0_25, %c0_26] : memref<8x4xf32, #tpu.memory_space<vmem>>, vector<8x4xf32>
    tpu.vector_store %arg11[%c0_25, %c0_26], %30 {strides = array<i32>} : memref<8x4xf32, #tpu.memory_space<vmem>>, vector<8x4xf32>,
    return
  }
  func.func @transform_0(%arg0: i32) -> (i32, i32) {
    %c0_i32 = arith.constant 0 : i32
    %c0_i32_0 = arith.constant 0 : i32
    return %arg0, %c0_i32 : i32, i32
  }
  func.func @transform_1(%arg0: i32) -> (i32, i32) {
    %c0_i32 = arith.constant 0 : i32
    %c0_i32_0 = arith.constant 0 : i32
    %c0_i32_1 = arith.constant 0 : i32
    return %c0_i32, %c0_i32_0 : i32, i32
  }
  func.func @transform_2(%arg0: i32) -> (i32, i32) {
    %c0_i32 = arith.constant 0 : i32
    %c0_i32_0 = arith.constant 0 : i32
    %c0_i32_1 = arith.constant 0 : i32
    return %c0_i32, %c0_i32_0 : i32, i32
  }
  func.func @transform_3(%arg0: i32) -> (i32, i32) {
    %c0_i32 = arith.constant 0 : i32
    %c0_i32_0 = arith.constant 0 : i32
    %c0_i32_1 = arith.constant 0 : i32
    return %c0_i32, %c0_i32_0 : i32, i32
  }
  func.func @transform_4(%arg0: i32) -> (i32, i32) {
    %c0_i32 = arith.constant 0 : i32
    %c0_i32_0 = arith.constant 0 : i32
    %c0_i32_1 = arith.constant 0 : i32
    return %c0_i32, %c0_i32_0 : i32, i32
  }
  func.func @transform_5(%arg0: i32) -> (i32, i32) {
    %c0_i32 = arith.constant 0 : i32
    %c0_i32_0 = arith.constant 0 : i32
    %c0_i32_1 = arith.constant 0 : i32
    return %c0_i32, %c0_i32_0 : i32, i32
  }
  func.func @transform_6(%arg0: i32) -> (i32, i32) {
    %c0_i32 = arith.constant 0 : i32
    %c0_i32_0 = arith.constant 0 : i32
    %c0_i32_1 = arith.constant 0 : i32
    return %c0_i32, %c0_i32_0 : i32, i32
  }
  func.func @transform_7(%arg0: i32) -> (i32, i32) {
    %c0_i32 = arith.constant 0 : i32
    %c0_i32_0 = arith.constant 0 : i32
    %c0_i32_1 = arith.constant 0 : i32
    return %c0_i32, %c0_i32_0 : i32, i32
  }
  func.func @transform_8(%arg0: i32) -> (i32, i32) {
    %c0_i32 = arith.constant 0 : i32
    %c0_i32_0 = arith.constant 0 : i32
    %c0_i32_1 = arith.constant 0 : i32
    return %c0_i32, %c0_i32_0 : i32, i32
  }
  func.func @transform_9(%arg0: i32) -> (i32, i32) {
    %c0_i32 = arith.constant 0 : i32
    %c0_i32_0 = arith.constant 0 : i32
    return %arg0, %c0_i32 : i32, i32
  }
  func.func @transform_10(%arg0: i32) -> (i32, i32) {
    %c0_i32 = arith.constant 0 : i32
    %c0_i32_0 = arith.constant 0 : i32
    return %arg0, %c0_i32 : i32, i32
  }
}

</mosaic_0001>

<bundles_post_ra>
// kernel: tpu_custom_call.1
= control target key start
LH: loop header
LB: loop body
LE: loop exit
PB: predicated region body
PF: predicated region fallthrough
CT: control target
= control target key end

     0   :  { %16 = vsyncpa [#allocation3], 0  ;;  %s890_s0 = inlined_call_operand.hbm [shape: f32[8,16], index: 0, kind: input, shape index: {}]   ;;  %s891_s1 = inlined_call_operand.hbm [shape: f32[16,128], index: 1, kind: input, shape index: {}]   ;;  %s892_s2 = inlined_call_operand.vmem [shape: f32[1,128], index: 2, kind: input, shape index: {}]   ;;  %s893_s3 = inlined_call_operand.hbm [shape: f32[128,128], index: 3, kind: input, shape index: {}]   ;;  %s894_s4 = inlined_call_operand.vmem [shape: f32[1,128], index: 4, kind: input, shape index: {}]   ;;  %s895_s5 = inlined_call_operand.hbm [shape: f32[128,128], index: 5, kind: input, shape index: {}]   ;;  %s896_s6 = inlined_call_operand.vmem [shape: f32[1,128], index: 6, kind: input, shape index: {}]   ;;  %s897_s7 = inlined_call_operand.hbm [shape: f32[128,256], index: 7, kind: input, shape index: {}]   ;;  %s898_s8 = inlined_call_operand.vmem [shape: f32[1,256], index: 8, kind: input, shape index: {}]   ;;  %s899_s9 = inlined_call_operand.vmem [shape: f32[8,4], index: 9, kind: output, shape index: {0}]   ;;  %s900_s10 = inlined_call_operand.vmem [shape: f32[8,4], index: 10, kind: output, shape index: {1}]  }
   0x1   :  { %17 = vsyncpa [#allocation5], 0 }
   0x2   :  { %18 = vsyncpa [#allocation8], 0  ;;  %s741_s13 = smov [#allocation4]  }
   0x3   :  { %s34_s14 = sshll.u32 %s741_s13, 4  ;;  %s35_s14 = int_to_ptr.vmem [resolvable:$true] %s34_s14 }
   0x4   :  { %s643_s15 = scalar_lea.vmem %s35_s14, 256  ;;  %p648_p1 = scmp.lt.s32.totalorder %s35_s14, %s35_s14 }
   0x5   :  { %p644_p0 = scmp.ne.s32.totalorder %s35_s14, %s643_s15  ;;  %p649_p2 = scmp.lt.s32.totalorder %s643_s15, %s643_s15 }
   0x7   :  { %p650_p3 = por %p649_p2, %p648_p1 }
   0x9   :  { %p651_p4 = pnand %p650_p3, %p644_p0 }
   0xb   :  { %654 = shalt.err (!%p651_p4)
}
   0xc   :  { %s742_s16 = smov 128   ;;  %s743_s17 = smov 8  }
   0xd   :  { %40 = dma.hbm_to_vmem [thread:$0]  %s891_s1, 256, %s35_s14, [#allocation5], %s742_s16, %s742_s16, %s743_s17  }
   0xe   :  { %s744_s20 = smov [#allocation7]   ;;  %s745_s22 = smov [#allocation2]  }
   0xf   :  { %s62_s21 = sshll.u32 %s744_s20, 4  ;;  %s25_s23 = sshll.u32 %s745_s22, 4  ;;  %s63_s21 = int_to_ptr.vmem [resolvable:$true] %s62_s21  ;;  %s26_s23 = int_to_ptr.vmem [resolvable:$true] %s25_s23 }
  0x10   :  { %s663_s24 = scalar_lea.vmem %s63_s21, 2048  ;;  %p668_p6 = scmp.lt.s32.totalorder %s63_s21, %s63_s21 }
  0x11   :  { %p664_p5 = scmp.ne.s32.totalorder %s63_s21, %s663_s24  ;;  %p669_p7 = scmp.lt.s32.totalorder %s663_s24, %s663_s24 }
  0x13   :  { %p670_p8 = por %p669_p7, %p668_p6 }
  0x15   :  { %p671_p9 = pnand %p670_p8, %p664_p5 }
  0x17   :  { %674 = shalt.err (!%p671_p9)
}
  0x18   :  { %68 = dma.hbm_to_vmem [thread:$0]  %s895_s5, 2048, %s63_s21, [#allocation8], %s742_s16, %s742_s16, %s743_s17  }
  0x19   :  { %s683_s1 = scalar_lea.vmem %s26_s23, 128  ;;  %p688_p11 = scmp.lt.s32.totalorder %s26_s23, %s26_s23 }
  0x1a   :  { %p684_p10 = scmp.ne.s32.totalorder %s26_s23, %s683_s1  ;;  %p689_p12 = scmp.lt.s32.totalorder %s683_s1, %s683_s1 }
  0x1c   :  { %p690_p13 = por %p689_p12, %p688_p11 }
  0x1e   :  { %p691_p0 = pnand %p690_p13, %p684_p10 }
  0x20   :  { %694 = shalt.err (!%p691_p0)
}
  0x21   :  { %28 = dma.hbm_to_vmem [thread:$0]  %s890_s0, 128, %s26_s23, [#allocation3]  }
  0x22   :  { %s746_s29 = smov [#allocation6]   ;;  %s747_s11 = smov [#allocation9]  }
  0x23   :  { %s48_s30 = sshll.u32 %s746_s29, 4  ;;  %s76_s12 = sshll.u32 %s747_s11, 4  ;;  %s49_s30 = int_to_ptr.vmem [resolvable:$true] %s48_s30  ;;  %s77_s12 = int_to_ptr.vmem [resolvable:$true] %s76_s12 }
  0x24   :  { %s703_s13 = scalar_lea.vmem %s49_s30, 2048  ;;  %p708_p2 = scmp.lt.s32.totalorder %s49_s30, %s49_s30 }
  0x25   :  { %p704_p1 = scmp.ne.s32.totalorder %s49_s30, %s703_s13  ;;  %p709_p3 = scmp.lt.s32.totalorder %s703_s13, %s703_s13 }
  0x27   :  { %p710_p4 = por %p709_p3, %p708_p2 }
  0x29   :  { %p711_p5 = pnand %p710_p4, %p704_p1 }
  0x2b   :  { %714 = shalt.err (!%p711_p5)
}
  0x2c   :  { %54 = dma.hbm_to_vmem [thread:$0]  %s893_s3, 2048, %s49_s30, [#allocation5], %s742_s16, %s742_s16, %s743_s17  }
  0x2d   :  { %s723_s0 = scalar_lea.vmem %s77_s12, 4096  ;;  %p728_p7 = scmp.lt.s32.totalorder %s77_s12, %s77_s12 }
  0x2e   :  { %p724_p6 = scmp.ne.s32.totalorder %s77_s12, %s723_s0  ;;  %p729_p8 = scmp.lt.s32.totalorder %s723_s0, %s723_s0 }
  0x30   :  { %p730_p9 = por %p729_p8, %p728_p7 }
  0x32   :  { %p731_p10 = pnand %p730_p9, %p724_p6 }
  0x34   :  { %734 = shalt.err (!%p731_p10)
}
  0x35   :  { %s748_s15 = smov 256   ;;  %s749_s18 = smov 16  }
  0x36   :  { %82 = dma.hbm_to_vmem [thread:$0]  %s897_s7, 4096, %s77_s12, [#allocation8], %s748_s15, %s748_s15, %s749_s18  }
  0x37   :  { %735 = dma.done.wait [#allocation3], 128  }
  0x38   :  { %736 = vsyncadd [#allocation3], 4294967168 }
  0x39   :  { %737 = dma.done.wait [#allocation5], 2304  }
  0x3a   :  { %738 = vsyncadd [#allocation5], 4294964992 }
  0x3b   :  { %739 = dma.done.wait [#allocation8], 6144  }
  0x3c   :  { %740 = vsyncadd [#allocation8], 4294961152  ;;  %v750_v0 = vmov 0.0   ;;  %vm751_vm0 = vmmov 0   ;;  %v102_v1 = vld [vmem:[#allocation4 + $0x8] sm:$0xff]  ;;  %v101_v2 = vld [vmem:[#allocation4] sm:$0xff] }
  0x3d   :  { %545 = vmatprep.subr.mxu0 %v750_v0  ;;  %549 = vmatprep.mubr.msk.f32.mxu0 %vm751_vm0, %v750_v0  ;;  %v100_v3 = vld [vmem:[#allocation2] sm:$0xff]  ;;  %vm110_vm1 = vcmask 130048   ;;  %v200_v4 = vld [vmem:[#allocation6 + $0x78] sm:$0xff]  ;;  %v199_v5 = vld [vmem:[#allocation6 + $0x70] sm:$0xff]  ;;  %vm488_vm2 = vcmask 31744  }
  0x3e   :  { %552 = vmatprep.subr.mxu1 %v750_v0  ;;  %584 = vmatprep.mubr.msk.f32.mxu1 %vm751_vm0, %v750_v0  ;;  %v198_v6 = vld [vmem:[#allocation6 + $0x68] sm:$0xff]  ;;  %v197_v7 = vld [vmem:[#allocation6 + $0x60] sm:$0xff]  ;;  %v196_v8 = vld [vmem:[#allocation6 + $0x58] sm:$0xff] }
  0x3f   :  { %546 = vmatpush3.msra.mxu0 %v102_v1  ;;  %553 = vmatpush3.msra.mxu1 %v200_v4  ;;  %v195_v9 = vld [vmem:[#allocation6 + $0x50] sm:$0xff]  ;;  %v194_v10 = vld [vmem:[#allocation6 + $0x48] sm:$0xff]  ;;  %v193_v11 = vld [vmem:[#allocation6 + $0x40] sm:$0xff] }
  0x40   :  { %547 = vmatprep.subr.mxu0 %v750_v0  ;;  %554 = vmatprep.subr.mxu1 %v750_v0  ;;  %v192_v12 = vld [vmem:[#allocation6 + $0x38] sm:$0xff]  ;;  %v191_v13 = vld [vmem:[#allocation6 + $0x30] sm:$0xff]  ;;  %v190_v14 = vld [vmem:[#allocation6 + $0x28] sm:$0xff] }
  0x41   :  { %548 = vmatpush3.msra.mxu0 %v101_v2  ;;  %555 = vmatpush3.msra.mxu1 %v199_v5  ;;  %v189_v15 = vld [vmem:[#allocation6 + $0x20] sm:$0xff]  ;;  %v188_v16 = vld [vmem:[#allocation6 + $0x18] sm:$0xff]  ;;  %v187_v17 = vld [vmem:[#allocation6 + $0x10] sm:$0xff] }
  0x42   :  { %550 = vmatmul.mubr.msk.f32.vlgmr.msra.gmra.mxu0 %vm110_vm1, %v100_v3  ;;  %556 = vmatprep.subr.mxu1 %v750_v0  ;;  %v186_v18 = vld [vmem:[#allocation6 + $0x8] sm:$0xff]  ;;  %v185_v19 = vld [vmem:[#allocation6] sm:$0xff]  ;;  %v294_v20 = vld [vmem:[#allocation7 + $0x78] sm:$0xff] }
  0x43   :  { %587 = vmatprep.subr.mxu0 %v750_v0  ;;  %557 = vmatpush3.msra.mxu1 %v198_v6  ;;  %v293_v21 = vld [vmem:[#allocation7 + $0x70] sm:$0xff]  ;;  %v292_v22 = vld [vmem:[#allocation7 + $0x68] sm:$0xff]  ;;  %v291_v23 = vld [vmem:[#allocation7 + $0x60] sm:$0xff] }
  0x44   :  { %619 = vmatprep.mubr.msk.f32.mxu0 %vm751_vm0, %v750_v0  ;;  %558 = vmatprep.subr.mxu1 %v750_v0  ;;  %v290_v24 = vld [vmem:[#allocation7 + $0x58] sm:$0xff]  ;;  %v289_v25 = vld [vmem:[#allocation7 + $0x50] sm:$0xff]  ;;  %v288_v26 = vld [vmem:[#allocation7 + $0x48] sm:$0xff] }
  0x45   :  { %559 = vmatpush3.msra.mxu1 %v197_v7  ;;  %588 = vmatpush3.msra.mxu0 %v294_v20  ;;  %v287_v27 = vld [vmem:[#allocation7 + $0x40] sm:$0xff]  ;;  %v286_v28 = vld [vmem:[#allocation7 + $0x38] sm:$0xff]  ;;  %v285_v29 = vld [vmem:[#allocation7 + $0x30] sm:$0xff] }
  0x46   :  { %560 = vmatprep.subr.mxu1 %v750_v0  ;;  %589 = vmatprep.subr.mxu0 %v750_v0  ;;  %v284_v30 = vld [vmem:[#allocation7 + $0x28] sm:$0xff]  ;;  %v283_v31 = vld [vmem:[#allocation7 + $0x20] sm:$0xff]  ;;  %v282_v32 = vld [vmem:[#allocation7 + $0x18] sm:$0xff] }
  0x47   :  { %561 = vmatpush3.msra.mxu1 %v196_v8  ;;  %590 = vmatpush3.msra.mxu0 %v293_v21  ;;  %v504_v33 = vld [vmem:[%s892_s2] ss:$0 sm:$0xff]  ;;  %v281_v38 = vld [vmem:[#allocation7 + $0x10] sm:$0xff]  ;;  %v279_v40 = vld [vmem:[#allocation7] sm:$0xff] }
  0x48   :  { %562 = vmatprep.subr.mxu1 %v750_v0  ;;  %591 = vmatprep.subr.mxu0 %v750_v0  ;;  %v280_v39 = vld [vmem:[#allocation7 + $0x8] sm:$0xff]  ;;  %v404_v41 = vld [vmem:[#allocation9 + $0xf8] sm:$0xff]  ;;  %v403_v42 = vld [vmem:[#allocation9 + $0xf0] sm:$0xff] }
  0x49   :  { %563 = vmatpush3.msra.mxu1 %v195_v9  ;;  %592 = vmatpush3.msra.mxu0 %v292_v22  ;;  %v402_v43 = vld [vmem:[#allocation9 + $0xe8] sm:$0xff]  ;;  %v401_v44 = vld [vmem:[#allocation9 + $0xe0] sm:$0xff]  ;;  %v400_v45 = vld [vmem:[#allocation9 + $0xd8] sm:$0xff] }
  0x4a   :  { %564 = vmatprep.subr.mxu1 %v750_v0  ;;  %593 = vmatprep.subr.mxu0 %v750_v0  ;;  %v399_v46 = vld [vmem:[#allocation9 + $0xd0] sm:$0xff]  ;;  %v398_v47 = vld [vmem:[#allocation9 + $0xc8] sm:$0xff]  ;;  %v397_v48 = vld [vmem:[#allocation9 + $0xc0] sm:$0xff] }
  0x4b   :  { %565 = vmatpush3.msra.mxu1 %v194_v10  ;;  %594 = vmatpush3.msra.mxu0 %v291_v23  ;;  %v396_v49 = vld [vmem:[#allocation9 + $0xb8] sm:$0xff]  ;;  %v395_v50 = vld [vmem:[#allocation9 + $0xb0] sm:$0xff]  ;;  %v394_v51 = vld [vmem:[#allocation9 + $0xa8] sm:$0xff] }
  0x4c   :  { %566 = vmatprep.subr.mxu1 %v750_v0  ;;  %595 = vmatprep.subr.mxu0 %v750_v0  ;;  %v393_v52 = vld [vmem:[#allocation9 + $0xa0] sm:$0xff]  ;;  %v392_v53 = vld [vmem:[#allocation9 + $0x98] sm:$0xff]  ;;  %v391_v54 = vld [vmem:[#allocation9 + $0x90] sm:$0xff] }
  0x4d   :  { %567 = vmatpush3.msra.mxu1 %v193_v11  ;;  %596 = vmatpush3.msra.mxu0 %v290_v24  ;;  %v390_v55 = vld [vmem:[#allocation9 + $0x88] sm:$0xff]  ;;  %v389_v56 = vld [vmem:[#allocation9 + $0x80] sm:$0xff]  ;;  %v388_v57 = vld [vmem:[#allocation9 + $0x78] sm:$0xff] }
  0x4e   :  { %568 = vmatprep.subr.mxu1 %v750_v0  ;;  %597 = vmatprep.subr.mxu0 %v750_v0  ;;  %v387_v58 = vld [vmem:[#allocation9 + $0x70] sm:$0xff]  ;;  %v386_v59 = vld [vmem:[#allocation9 + $0x68] sm:$0xff]  ;;  %v385_v60 = vld [vmem:[#allocation9 + $0x60] sm:$0xff] }
  0x4f   :  { %569 = vmatpush3.msra.mxu1 %v192_v12  ;;  %598 = vmatpush3.msra.mxu0 %v289_v25  ;;  %v384_v61 = vld [vmem:[#allocation9 + $0x58] sm:$0xff]  ;;  %v383_v62 = vld [vmem:[#allocation9 + $0x50] sm:$0xff]  ;;  %v382_v63 = vld [vmem:[#allocation9 + $0x48] sm:$0xff] }
  0x50   :  { %570 = vmatprep.subr.mxu1 %v750_v0  ;;  %599 = vmatprep.subr.mxu0 %v750_v0  ;;  %v380_v1 = vld [vmem:[#allocation9 + $0x38] sm:$0xff]  ;;  %v379_v2 = vld [vmem:[#allocation9 + $0x30] sm:$0xff]  ;;  %v378_v3 = vld [vmem:[#allocation9 + $0x28] sm:$0xff] }
  0x51   :  { %571 = vmatpush3.msra.mxu1 %v191_v13  ;;  %600 = vmatpush3.msra.mxu0 %v288_v26  ;;  %v506_v4 = vld [vmem:[%s894_s4] ss:$0 sm:$0xff]  ;;  %v377_v9 = vld [vmem:[#allocation9 + $0x20] sm:$0xff]  ;;  %v376_v10 = vld [vmem:[#allocation9 + $0x18] sm:$0xff] }
  0x52   :  { %572 = vmatprep.subr.mxu1 %v750_v0  ;;  %601 = vmatprep.subr.mxu0 %v750_v0  ;;  %v375_v11 = vld [vmem:[#allocation9 + $0x10] sm:$0xff]  ;;  %v374_v12 = vld [vmem:[#allocation9 + $0x8] sm:$0xff]  ;;  %v373_v13 = vld [vmem:[#allocation9] sm:$0xff] }
  0x53   :  { %573 = vmatpush3.msra.mxu1 %v190_v14  ;;  %602 = vmatpush3.msra.mxu0 %v287_v27  ;;  %v507_v14 = vld [vmem:[%s896_s6] ss:$0 sm:$0xff] }
  0x54   :  { %574 = vmatprep.subr.mxu1 %v750_v0  ;;  %603 = vmatprep.subr.mxu0 %v750_v0  ;;  %v405_v22 = vld [vmem:[%s898_s8] sm:$0x3] }
  0x55   :  { %575 = vmatpush3.msra.mxu1 %v189_v15  ;;  %604 = vmatpush3.msra.mxu0 %v286_v28 }
  0x56   :  { %576 = vmatprep.subr.mxu1 %v750_v0  ;;  %605 = vmatprep.subr.mxu0 %v750_v0 }
  0x57   :  { %577 = vmatpush3.msra.mxu1 %v188_v16  ;;  %606 = vmatpush3.msra.mxu0 %v285_v29 }
  0x58   :  { %578 = vmatprep.subr.mxu1 %v750_v0  ;;  %607 = vmatprep.subr.mxu0 %v750_v0 }
  0x59   :  { %579 = vmatpush3.msra.mxu1 %v187_v17  ;;  %608 = vmatpush3.msra.mxu0 %v284_v30 }
  0x5a   :  { %580 = vmatprep.subr.mxu1 %v750_v0  ;;  %609 = vmatprep.subr.mxu0 %v750_v0 }
  0x5b   :  { %581 = vmatpush3.msra.mxu1 %v186_v18  ;;  %610 = vmatpush3.msra.mxu0 %v283_v31 }
  0x5c   :  { %582 = vmatprep.subr.mxu1 %v750_v0  ;;  %611 = vmatprep.subr.mxu0 %v750_v0 }
  0x5d   :  { %583 = vmatpush3.msra.mxu1 %v185_v19  ;;  %612 = vmatpush3.msra.mxu0 %v282_v32  ;;  %v407_v19 = vlaneseq }
  0x5e   :  { %613 = vmatprep.subr.mxu0 %v750_v0  ;;  %417 = vmatprep.subr.mxu1 %v404_v41 }
  0x5f   :  { %614 = vmatpush3.msra.mxu0 %v281_v38  ;;  %v408_v20 = vshrl.u32 %v407_v19, 7 }
  0x60   :  { %615 = vmatprep.subr.mxu0 %v750_v0 }
  0x61   :  { %616 = vmatpush3.msra.mxu0 %v280_v39  ;;  %v409_v21 = vsub.s32 0, %v408_v20  ;;  %v413_v23 = vsub.s32 1, %v408_v20 }
  0x62   :  { %617 = vmatprep.subr.mxu0 %v750_v0 }
  0x63   :  { %618 = vmatpush3.msra.mxu0 %v279_v40  ;;  %v410_v24 = vrot.slane %v405_v22, %v409_v21  ;;  %v414_v25 = vrot.slane %v405_v22, %v413_v23 }
 0x102   :  { %v180_v34 = vpop.f32.mrf.mxu0 }
 0x103   :  { %v181_v35 = vadd.f32 %v504_v33, %v180_v34 }
 0x104   :  { %v551_v36 = vpop.f32.mrf.mxu0 }
 0x105   :  { %v184_v37 = vmax.f32 %v181_v35, 0.0 }
 0x107   :  { %585 = vmatmul.mubr.f32.vlgmr.msra.gmra.mxu1 %v184_v37 }
 0x108   :  { %481 = vmatprep.mubr.f32.mxu1 %v750_v0  ;;  %418 = vmatpush1.msra.mxu1 %v403_v42  ;;  %v381_v0 = vld [vmem:[#allocation9 + $0x40] sm:$0xff] }
 0x109   :  { %419 = vmatprep.subr.mxu1 %v402_v43 }
 0x10a   :  { %420 = vmatpush1.msra.mxu1 %v401_v44 }
 0x10b   :  { %421 = vmatprep.subr.mxu1 %v400_v45 }
 0x10c   :  { %422 = vmatpush1.msra.mxu1 %v399_v46 }
 0x10d   :  { %423 = vmatprep.subr.mxu1 %v398_v47 }
 0x10e   :  { %424 = vmatpush1.msra.mxu1 %v397_v48 }
 0x10f   :  { %425 = vmatprep.subr.mxu1 %v396_v49 }
 0x110   :  { %426 = vmatpush1.msra.mxu1 %v395_v50 }
 0x111   :  { %427 = vmatprep.subr.mxu1 %v394_v51 }
 0x112   :  { %428 = vmatpush1.msra.mxu1 %v393_v52 }
 0x113   :  { %429 = vmatprep.subr.mxu1 %v392_v53 }
 0x114   :  { %430 = vmatpush1.msra.mxu1 %v391_v54 }
 0x115   :  { %431 = vmatprep.subr.mxu1 %v390_v55 }
 0x116   :  { %432 = vmatpush1.msra.mxu1 %v389_v56 }
 0x117   :  { %433 = vmatprep.subr.mxu1 %v388_v57 }
 0x118   :  { %434 = vmatpush1.msra.mxu1 %v387_v58 }
 0x119   :  { %435 = vmatprep.subr.mxu1 %v386_v59 }
 0x11a   :  { %436 = vmatpush1.msra.mxu1 %v385_v60 }
 0x11b   :  { %437 = vmatprep.subr.mxu1 %v384_v61 }
 0x11c   :  { %438 = vmatpush1.msra.mxu1 %v383_v62 }
 0x11d   :  { %439 = vmatprep.subr.mxu1 %v382_v63 }
 0x11e   :  { %440 = vmatpush1.msra.mxu1 %v381_v0 }
 0x11f   :  { %441 = vmatprep.subr.mxu1 %v380_v1 }
 0x120   :  { %442 = vmatpush1.msra.mxu1 %v379_v2 }
 0x121   :  { %443 = vmatprep.subr.mxu1 %v378_v3 }
 0x122   :  { %444 = vmatpush1.msra.mxu1 %v377_v9 }
 0x123   :  { %445 = vmatprep.subr.mxu1 %v376_v10 }
 0x124   :  { %446 = vmatpush1.msra.mxu1 %v375_v11 }
 0x125   :  { %447 = vmatprep.subr.mxu1 %v374_v12 }
 0x126   :  { %448 = vmatpush1.msra.mxu1 %v373_v13 }
 0x1c7   :  { %v274_v5 = vpop.f32.mrf.mxu1 }
 0x1c8   :  { %v275_v6 = vadd.f32 %v506_v4, %v274_v5 }
 0x1c9   :  { %v586_v7 = vpop.f32.mrf.mxu1 }
 0x1ca   :  { %v278_v8 = vmax.f32 %v275_v6, 0.0 }
 0x1cc   :  { %620 = vmatmul.mubr.f32.vlgmr.msra.gmra.mxu0 %v278_v8 }
 0x28c   :  { %v368_v15 = vpop.f32.mrf.mxu0 }
 0x28d   :  { %v369_v16 = vadd.f32 %v507_v14, %v368_v15 }
 0x28e   :  { %v621_v17 = vpop.f32.mrf.mxu0 }
 0x28f   :  { %v372_v18 = vmax.f32 %v369_v16, 0.0 }
 0x291   :  { %482 = vmatmul.mubr.f32.vlgmr.msra.gmra.mxu1 %v372_v18 }
 0x351   :  { %v483_v26 = vpop.f32.mrf.mxu1 }
 0x352   :  { %v484_v27 = vadd.f32 %v483_v26, %v410_v24 }
 0x353   :  { %v485_v28 = vpop.f32.mrf.mxu1 }
 0x354   :  { %489 = vst.msk [vmem:[%s899_s9] sm:$0xff] %vm488_vm2, %v484_v27  ;;  %v486_v29 = vadd.f32 %v485_v28, %v414_v25 }
 0x356   :  { %v490_v30 = vmul.f32 1.442695, %v486_v29 }
 0x358   :  { %633 = vpow2.f32 %v490_v30 }
 0x365   :  { %v634_v31 = vpop.eup %633 }
 0x366   :  { %492 = vst.msk [vmem:[%s900_s10] sm:$0xff] %vm488_vm2, %v634_v31 }
 0x367   :  { %501 = vsyncpa [#allocation3], 1 }
 0x368   :  { %502 = vsyncpa [#allocation5], 1 }
 0x369   :  { %503 = vsyncpa [#allocation8], 1 }

</bundles_post_ra>
